<compile_context>
chip_gen: v5e
topology: v5e:2x2
jax: 0.10.0
libtpu: 0.0.40
codegen_flags: <defaults>
</compile_context>

<pallas_src>
import functools
import math

import jax
import jax.numpy as jnp
from jax import lax
from jax.experimental import pallas as pl
from jax.experimental.pallas import tpu as pltpu

_COS_EPS = 1e-8          # torch F.cosine_similarity default eps
_LANE = 128
_MIB = 1024 * 1024


# --------------------------------------------------------------------------- #
# Small helpers (all Python / trace-time)
# --------------------------------------------------------------------------- #
def _round_up(v, mult):
    return ((v + mult - 1) // mult) * mult


def _vmem_capacity_bytes():
    try:
        return int(pltpu.get_tpu_info().vmem_capacity_bytes)
    except Exception:
        return 64 * _MIB          # conservative default (v7x-sized part)


def _vmem_budgets():
    cap = _vmem_capacity_bytes()
    if cap <= 64 * _MIB:          # v7x: 64 MiB physical VMEM per TensorCore
        budget = 40 * _MIB
    else:                         # v5e / v6e: 128 MiB physical VMEM
        budget = 96 * _MIB
    limit = min(cap - 8 * _MIB, budget + 8 * _MIB)
    return budget, limit


def _plan_lane_blocks(b, n, m, d, budget_bytes):
    """(b_blk, num_blocks, b_pad) for the batch-on-lanes path, or None if even
    a single 128-lane block would blow the VMEM budget."""
    m8 = _round_up(m, 8)
    d8 = _round_up(d, 8)
    live = 5                                    # c_hat + Sinkhorn/transport temps
    per_lane = 4 * (live * n * m8               # (N, M, Bb) f32 live arrays
                    + 2 * n * d8                # x block (N, D, Bb), double-buffered
                    + 2 * d * m8                # y block (D, M, Bb), double-buffered
                    + n * 8 + m8                # f_hat, g_hat
                    + 2 * 8)                    # output block (8, Bb), double-buffered
    cap_groups = budget_bytes // (per_lane * _LANE)
    if cap_groups < 1:
        return None
    groups_needed = pl.cdiv(b, _LANE)
    k = min(groups_needed, int(cap_groups))
    # Prefer >= 2 grid blocks when the batch spans >= 2 lane groups so both
    # v7x TensorCores get work (harmless single extra grid step on v5e/v6e).
    if k == groups_needed and groups_needed >= 2:
        k = pl.cdiv(groups_needed, 2)
    b_blk = k * _LANE
    num_blocks = pl.cdiv(groups_needed, k)
    return b_blk, num_blocks, num_blocks * b_blk


def _plan_batch_blocks(b, n, m, d, budget_bytes):
    """(b_blk, num_blocks, b_pad) for the batch-leading fallback path."""
    n8 = _round_up(n, 8)
    m128 = _round_up(m, _LANE)
    d128 = _round_up(d, _LANE)
    live = 5
    per_batch = 4 * (live * n8 * m128            # (Bb, N, M) f32 live arrays
                     + 2 * n8 * d128             # x block (Bb, N, D), double-buffered
                     + 2 * 8 * m128              # yT block (Bb, D, M), double-buffered
                     + n8 * _LANE + 8 * m128)    # f_hat (Bb,N,1), g_hat (Bb,1,M)
    b_blk = max(1, min(b, budget_bytes // per_batch))
    if b_blk >= b and b >= 2:
        b_blk = pl.cdiv(b, 2)                    # >= 2 grid blocks for v7x megacore
    num_blocks = pl.cdiv(b, b_blk)
    return b_blk, num_blocks, num_blocks * b_blk


# --------------------------------------------------------------------------- #
# Shared in-kernel math
# --------------------------------------------------------------------------- #
def _pow_cost(omc, p):
    """(1 - cos)**p with integer p kept on the VPU (no pow of a negative)."""
    if p == 1:
        return omc
    if p == 2:
        return omc * omc
    if float(p).is_integer() and float(p) > 0:
        return lax.integer_pow(omc, int(p))
    return omc ** jnp.float32(p)


def _lse(z, axis):
    zmax = jnp.max(z, axis=axis, keepdims=True)
    return zmax + jnp.log(jnp.sum(jnp.exp(z - zmax), axis=axis, keepdims=True))


def _sinkhorn_transport_cost(c_hat, *, n_axis, m_axis, reg, n_iters, unroll):
    """Log-domain Sinkhorn with uniform marginals on the reg-scaled cost c_hat.

    Returns reg * <P, C>, reduced (keepdims) over n_axis and m_axis.
    """
    shape = c_hat.shape
    n = shape[n_axis]
    m = shape[m_axis]
    log_a = jnp.float32(-math.log(n))            # compile-time scalar marginals
    log_b = jnp.float32(-math.log(m))

    f_shape = tuple(1 if ax == m_axis else s for ax, s in enumerate(shape))
    g_shape = tuple(1 if ax == n_axis else s for ax, s in enumerate(shape))

    def one_step(carry):
        f_hat, g_hat = carry
        f_hat = log_a - _lse(g_hat - c_hat, axis=m_axis)
        g_hat = log_b - _lse(f_hat - c_hat, axis=n_axis)
        return f_hat, g_hat

    n_unroll = max(1, int(unroll))
    main_iters = int(n_iters) // n_unroll
    rem = int(n_iters) - main_iters * n_unroll

    def unrolled_body(_, carry):
        for _j in range(n_unroll):
            carry = one_step(carry)
        return carry

    carry = (jnp.zeros(f_shape, jnp.float32), jnp.zeros(g_shape, jnp.float32))
    if main_iters > 0:
        carry = lax.fori_loop(0, main_iters, unrolled_body, carry)
    for _ in range(rem):
        carry = one_step(carry)
    f_hat, g_hat = carry

    plan = jnp.exp((f_hat + g_hat) - c_hat)
    pc = plan * c_hat
    cost = jnp.sum(pc, axis=m_axis, keepdims=True)
    cost = jnp.sum(cost, axis=n_axis, keepdims=True)
    return jnp.float32(reg) * cost


# --------------------------------------------------------------------------- #
# Kernels
# --------------------------------------------------------------------------- #
def _w_cos_lanes_kernel(x_ref, y_ref, o_ref, *, p, reg, n_iters, unroll):
    """Batch-on-lanes layout: x (N, D, Bb), y (D, M, Bb), out (8, Bb)."""
    x = x_ref[...].astype(jnp.float32)        # (N, D, Bb)
    y = y_ref[...].astype(jnp.float32)        # (D, M, Bb)
    n, d, bb = x.shape
    m = y.shape[1]

    # ---- cosine similarity, torch eps-clamp semantics ----
    eps2 = jnp.float32(_COS_EPS * _COS_EPS)
    x_inv = lax.rsqrt(jnp.maximum(jnp.sum(x * x, axis=1, keepdims=True), eps2))  # (N,1,Bb)
    y_inv = lax.rsqrt(jnp.maximum(jnp.sum(y * y, axis=0, keepdims=True), eps2))  # (1,M,Bb)
    xn = x * x_inv                             # (N, D, Bb)
    yn = y * y_inv                             # (D, M, Bb)

    # cos[n, m, b] = sum_d xn[n, d, b] * yn[d, m, b]
    # VPU broadcast mul-adds; both operands are pure slices (no relayout, no MXU).
    cos = xn[:, 0:1, :] * yn[0:1]
    for dd in range(1, d):
        cos = cos + xn[:, dd:dd + 1, :] * yn[dd:dd + 1]     # (N, M, Bb)
    cos = jnp.clip(cos, -1.0, 1.0)
    c = _pow_cost(1.0 - cos, p)                              # (N, M, Bb)

    c_hat = c * jnp.float32(1.0 / reg)         # single resident (N, M, Bb) array
    cost = _sinkhorn_transport_cost(c_hat, n_axis=0, m_axis=1, reg=reg,
                                    n_iters=n_iters, unroll=unroll)   # (1, 1, Bb)
    o_ref[...] = jnp.broadcast_to(cost.reshape(1, bb), o_ref.shape)   # lane-dense store


def _w_cos_batch_kernel(x_ref, yt_ref, o_ref, *, p, reg, n_iters, unroll):
    """Batch-leading fallback for large N*M: x (Bb, N, D), yT (Bb, D, M)."""
    x = x_ref[...].astype(jnp.float32)         # (Bb, N, D)
    yt = yt_ref[...].astype(jnp.float32)       # (Bb, D, M)
    bb, n, d = x.shape
    m = yt.shape[2]

    eps2 = jnp.float32(_COS_EPS * _COS_EPS)
    x_inv = lax.rsqrt(jnp.maximum(jnp.sum(x * x, axis=2, keepdims=True), eps2))    # (Bb,N,1)
    y_inv = lax.rsqrt(jnp.maximum(jnp.sum(yt * yt, axis=1, keepdims=True), eps2))  # (Bb,1,M)
    xn = x * x_inv
    ynt = yt * y_inv

    cos = xn[:, :, 0:1] * ynt[:, 0:1, :]
    for dd in range(1, d):
        cos = cos + xn[:, :, dd:dd + 1] * ynt[:, dd:dd + 1, :]   # (Bb, N, M)
    cos = jnp.clip(cos, -1.0, 1.0)
    c = _pow_cost(1.0 - cos, p)

    c_hat = c * jnp.float32(1.0 / reg)
    cost = _sinkhorn_transport_cost(c_hat, n_axis=1, m_axis=2, reg=reg,
                                    n_iters=n_iters, unroll=unroll)   # (Bb, 1, 1)
    o_ref[...] = cost


# --------------------------------------------------------------------------- #
# Wrapper
# --------------------------------------------------------------------------- #
@functools.partial(jax.jit, static_argnames=("p", "reg", "n_iters", "unroll"))
def cos_similarity_w(x, y, p=1, reg=0.01, n_iters=500, unroll=2):
    """JAX/Pallas equivalent of Cos_similarity_W.forward(x, y)."""
    b, n, d = x.shape
    b2, m, d2 = y.shape
    assert d == d2 and b == b2, "x: (B, N, D), y: (B, M, D)"

    budget, vmem_limit = _vmem_budgets()
    kernel_kw = dict(p=p, reg=float(reg), n_iters=int(n_iters), unroll=int(unroll))
    lane_plan = _plan_lane_blocks(b, n, m, d, budget)

    if lane_plan is not None:
        # ---- primary path: batch packed on the 128-wide lane axis ----
        b_blk, num_blocks, b_pad = lane_plan
        x_f = x.astype(jnp.float32)
        y_f = y.astype(jnp.float32)
        if b_pad != b:
            x_f = jnp.pad(x_f, ((0, b_pad - b), (0, 0), (0, 0)))
            y_f = jnp.pad(y_f, ((0, b_pad - b), (0, 0), (0, 0)))
        x_t = jnp.transpose(x_f, (1, 2, 0))          # (N, D, B_pad)
        y_t = jnp.transpose(y_f, (2, 1, 0))          # (D, M, B_pad)

        per_batch = pl.pallas_call(
            functools.partial(_w_cos_lanes_kernel, **kernel_kw),
            out_shape=jax.ShapeDtypeStruct((8, b_pad), jnp.float32),
            grid_spec=pltpu.PrefetchScalarGridSpec(
                num_scalar_prefetch=0,
                grid=(num_blocks,),
                in_specs=[
                    pl.BlockSpec((n, d, b_blk), lambda i: (0, 0, i)),   # x  (N, D, B)
                    pl.BlockSpec((d, m, b_blk), lambda i: (0, 0, i)),   # y  (D, M, B)
                ],
                out_specs=pl.BlockSpec((8, b_blk), lambda i: (0, i)),
            ),
            compiler_params=pltpu.CompilerParams(
                dimension_semantics=("parallel",),
                vmem_limit_bytes=vmem_limit,
            ),
        )(x_t, y_t)
        w = per_batch[0, :b]
    else:
        # ---- fallback for large N*M: batch-leading layout, small b_blk ----
        b_blk, num_blocks, b_pad = _plan_batch_blocks(b, n, m, d, budget)
        x_f = x.astype(jnp.float32)
        y_t = jnp.swapaxes(y.astype(jnp.float32), 1, 2)      # (B, D, M)
        if b_pad != b:
            pad = b_pad - b
            x_f = jnp.pad(x_f, ((0, pad), (0, 0), (0, 0)))
            y_t = jnp.pad(y_t, ((0, pad), (0, 0), (0, 0)))

        per_batch = pl.pallas_call(
            functools.partial(_w_cos_batch_kernel, **kernel_kw),
            out_shape=jax.ShapeDtypeStruct((b_pad, 1, 1), jnp.float32),
            grid_spec=pltpu.PrefetchScalarGridSpec(
                num_scalar_prefetch=0,
                grid=(num_blocks,),
                in_specs=[
                    pl.BlockSpec((b_blk, n, d), lambda i: (i, 0, 0)),   # x  (B, N, D)
                    pl.BlockSpec((b_blk, d, m), lambda i: (i, 0, 0)),   # yT (B, D, M)
                ],
                out_specs=pl.BlockSpec((b_blk, 1, 1), lambda i: (i, 0, 0)),
            ),
            compiler_params=pltpu.CompilerParams(
                dimension_semantics=("parallel",),
                vmem_limit_bytes=vmem_limit,
            ),
        )(x_f, y_t)
        w = per_batch[:b, 0, 0]

    # pow(emd2, 1/p) per batch element, then batch average (PyTorch semantics).
    if p != 1:
        w = w ** (1.0 / float(p))
    if b >= 2:
        return jnp.sum(w) / b
    return w[0]


if __name__ == "__main__":
    key = jax.random.PRNGKey(0)
    kx, ky = jax.random.split(key)

    B, N, M, D = 2, 8, 8, 3     # source B x N x 3, target B x M x 3
    x = jax.random.normal(kx, (B, N, D), dtype=jnp.float32)
    y = jax.random.normal(ky, (B, M, D), dtype=jnp.float32)

    out = cos_similarity_w(x, y, p=1)
    out = jax.block_until_ready(out)
    assert out.shape == () and jnp.isfinite(out)
    print("KERNEL_OK")
</pallas_src>

<mosaic_0001>
module attributes {stable_mosaic.version = 11 : i64} {
  func.func @_w_cos_lanes_kernel(%arg0: i32, %arg1: memref<8x3x128xf32, #tpu.memory_space<vmem>>, %arg2: memref<3x8x128xf32, #tpu.memory_space<vmem>>, %arg3: memref<8x128xf32, #tpu.memory_space<vmem>>) attributes {dimension_semantics = [#tpu.dimension_semantics<parallel>], iteration_bounds = array<i64: 1>, scalar_prefetch = 0 : i64, scratch_operands = 0 : i64, tpu.core_type = #tpu.core_type<tc>, window_params = [{transform_indices = @transform_0, window_bounds = array<i64: 8, 3, 128>}, {transform_indices = @transform_1, window_bounds = array<i64: 3, 8, 128>}, {transform_indices = @transform_2, window_bounds = array<i64: 8, 128>}]} {
    %c0 = arith.constant 0 : index
    %c0_0 = arith.constant 0 : index
    %c0_1 = arith.constant 0 : index
    %0 = vector.load %arg1[%c0, %c0_0, %c0_1] : memref<8x3x128xf32, #tpu.memory_space<vmem>>, vector<8x3x128xf32>
    %c0_2 = arith.constant 0 : index
    %c0_3 = arith.constant 0 : index
    %c0_4 = arith.constant 0 : index
    %1 = vector.load %arg2[%c0_2, %c0_3, %c0_4] : memref<3x8x128xf32, #tpu.memory_space<vmem>>, vector<3x8x128xf32>
    %2 = arith.mulf %0, %0 : vector<8x3x128xf32>
    %cst = arith.constant dense<0.000000e+00> : vector<8x128xf32>
    %3 = vector.multi_reduction <add>, %2, %cst [1] : vector<8x3x128xf32> to vector<8x128xf32>
    %4 = vector.shape_cast %3 : vector<8x128xf32> to vector<8x1x128xf32>
    %cst_5 = arith.constant 1.000000e-16 : f32
    %5 = vector.broadcast %cst_5 : f32 to vector<8x1x128xf32>
    %6 = arith.maximumf %4, %5 : vector<8x1x128xf32>
    %7 = math.rsqrt %6 : vector<8x1x128xf32>
    %8 = arith.mulf %1, %1 : vector<3x8x128xf32>
    %cst_6 = arith.constant dense<0.000000e+00> : vector<8x128xf32>
    %9 = vector.multi_reduction <add>, %8, %cst_6 [0] : vector<3x8x128xf32> to vector<8x128xf32>
    %10 = vector.shape_cast %9 : vector<8x128xf32> to vector<1x8x128xf32>
    %cst_7 = arith.constant 1.000000e-16 : f32
    %11 = vector.broadcast %cst_7 : f32 to vector<1x8x128xf32>
    %12 = arith.maximumf %10, %11 : vector<1x8x128xf32>
    %13 = math.rsqrt %12 : vector<1x8x128xf32>
    %14 = vector.broadcast %7 : vector<8x1x128xf32> to vector<8x3x128xf32>
    %15 = arith.mulf %0, %14 : vector<8x3x128xf32>
    %16 = vector.broadcast %13 : vector<1x8x128xf32> to vector<3x8x128xf32>
    %17 = arith.mulf %1, %16 : vector<3x8x128xf32>
    %18 = vector.extract_strided_slice %15 {offsets = [0, 0, 0], sizes = [8, 1, 128], strides = [1, 1, 1]} : vector<8x3x128xf32> to vector<8x1x128xf32>
    %19 = vector.extract_strided_slice %17 {offsets = [0, 0, 0], sizes = [1, 8, 128], strides = [1, 1, 1]} : vector<3x8x128xf32> to vector<1x8x128xf32>
    %20 = vector.broadcast %18 : vector<8x1x128xf32> to vector<8x8x128xf32>
    %21 = vector.broadcast %19 : vector<1x8x128xf32> to vector<8x8x128xf32>
    %22 = arith.mulf %20, %21 : vector<8x8x128xf32>
    %23 = vector.extract_strided_slice %15 {offsets = [0, 1, 0], sizes = [8, 1, 128], strides = [1, 1, 1]} : vector<8x3x128xf32> to vector<8x1x128xf32>
    %24 = vector.extract_strided_slice %17 {offsets = [1, 0, 0], sizes = [1, 8, 128], strides = [1, 1, 1]} : vector<3x8x128xf32> to vector<1x8x128xf32>
    %25 = vector.broadcast %23 : vector<8x1x128xf32> to vector<8x8x128xf32>
    %26 = vector.broadcast %24 : vector<1x8x128xf32> to vector<8x8x128xf32>
    %27 = arith.mulf %25, %26 : vector<8x8x128xf32>
    %28 = arith.addf %22, %27 : vector<8x8x128xf32>
    %29 = vector.extract_strided_slice %15 {offsets = [0, 2, 0], sizes = [8, 1, 128], strides = [1, 1, 1]} : vector<8x3x128xf32> to vector<8x1x128xf32>
    %30 = vector.extract_strided_slice %17 {offsets = [2, 0, 0], sizes = [1, 8, 128], strides = [1, 1, 1]} : vector<3x8x128xf32> to vector<1x8x128xf32>
    %31 = vector.broadcast %29 : vector<8x1x128xf32> to vector<8x8x128xf32>
    %32 = vector.broadcast %30 : vector<1x8x128xf32> to vector<8x8x128xf32>
    %33 = arith.mulf %31, %32 : vector<8x8x128xf32>
    %34 = arith.addf %28, %33 : vector<8x8x128xf32>
    %cst_8 = arith.constant -1.000000e+00 : f32
    %cst_9 = arith.constant 1.000000e+00 : f32
    %35 = vector.broadcast %cst_8 : f32 to vector<8x8x128xf32>
    %36 = arith.maximumf %35, %34 : vector<8x8x128xf32>
    %37 = vector.broadcast %cst_9 : f32 to vector<8x8x128xf32>
    %38 = arith.minimumf %37, %36 : vector<8x8x128xf32>
    %cst_10 = arith.constant 1.000000e+00 : f32
    %39 = vector.broadcast %cst_10 : f32 to vector<8x8x128xf32>
    %40 = arith.subf %39, %38 : vector<8x8x128xf32>
    %cst_11 = arith.constant 1.000000e+02 : f32
    %41 = vector.broadcast %cst_11 : f32 to vector<8x8x128xf32>
    %42 = arith.mulf %40, %41 : vector<8x8x128xf32>
    %cst_12 = arith.constant 0.000000e+00 : f32
    %43 = vector.broadcast %cst_12 : f32 to vector<8x1x128xf32>
    %cst_13 = arith.constant 0.000000e+00 : f32
    %44 = vector.broadcast %cst_13 : f32 to vector<1x8x128xf32>
    %cst_14 = arith.constant -2.07944155 : f32
    %cst_15 = arith.constant -2.07944155 : f32
    %c0_i32 = arith.constant 0 : i32
    %c250_i32 = arith.constant 250 : i32
    %45 = arith.addi %c0_i32, %c250_i32 : i32
    %c1_i32 = arith.constant 1 : i32
    %46:2 = scf.for %arg4 = %c0_i32 to %45 step %c1_i32 iter_args(%arg5 = %43, %arg6 = %44) -> (vector<8x1x128xf32>, vector<1x8x128xf32>)  : i32 {
      %63 = vector.broadcast %arg6 : vector<1x8x128xf32> to vector<8x8x128xf32>
      %64 = arith.subf %63, %42 : vector<8x8x128xf32>
      %cst_21 = arith.constant dense<0xFF800000> : vector<8x128xf32>
      %65 = vector.multi_reduction <maximumf>, %64, %cst_21 [1] : vector<8x8x128xf32> to vector<8x128xf32>
      %66 = vector.shape_cast %65 : vector<8x128xf32> to vector<8x1x128xf32>
      %67 = vector.broadcast %66 : vector<8x1x128xf32> to vector<8x8x128xf32>
      %68 = arith.subf %64, %67 : vector<8x8x128xf32>
      %69 = math.exp %68 : vector<8x8x128xf32>
      %cst_22 = arith.constant dense<0.000000e+00> : vector<8x128xf32>
      %70 = vector.multi_reduction <add>, %69, %cst_22 [1] : vector<8x8x128xf32> to vector<8x128xf32>
      %71 = vector.shape_cast %70 : vector<8x128xf32> to vector<8x1x128xf32>
      %72 = math.log %71 : vector<8x1x128xf32>
      %73 = arith.addf %66, %72 : vector<8x1x128xf32>
      %74 = vector.broadcast %cst_14 : f32 to vector<8x1x128xf32>
      %75 = arith.subf %74, %73 : vector<8x1x128xf32>
      %76 = vector.broadcast %75 : vector<8x1x128xf32> to vector<8x8x128xf32>
      %77 = arith.subf %76, %42 : vector<8x8x128xf32>
      %cst_23 = arith.constant dense<0xFF800000> : vector<8x128xf32>
      %78 = vector.multi_reduction <maximumf>, %77, %cst_23 [0] : vector<8x8x128xf32> to vector<8x128xf32>
      %79 = vector.shape_cast %78 : vector<8x128xf32> to vector<1x8x128xf32>
      %80 = vector.broadcast %79 : vector<1x8x128xf32> to vector<8x8x128xf32>
      %81 = arith.subf %77, %80 : vector<8x8x128xf32>
      %82 = math.exp %81 : vector<8x8x128xf32>
      %cst_24 = arith.constant dense<0.000000e+00> : vector<8x128xf32>
      %83 = vector.multi_reduction <add>, %82, %cst_24 [0] : vector<8x8x128xf32> to vector<8x128xf32>
      %84 = vector.shape_cast %83 : vector<8x128xf32> to vector<1x8x128xf32>
      %85 = math.log %84 : vector<1x8x128xf32>
      %86 = arith.addf %79, %85 : vector<1x8x128xf32>
      %87 = vector.broadcast %cst_15 : f32 to vector<1x8x128xf32>
      %88 = arith.subf %87, %86 : vector<1x8x128xf32>
      %89 = vector.broadcast %88 : vector<1x8x128xf32> to vector<8x8x128xf32>
      %90 = arith.subf %89, %42 : vector<8x8x128xf32>
      %cst_25 = arith.constant dense<0xFF800000> : vector<8x128xf32>
      %91 = vector.multi_reduction <maximumf>, %90, %cst_25 [1] : vector<8x8x128xf32> to vector<8x128xf32>
      %92 = vector.shape_cast %91 : vector<8x128xf32> to vector<8x1x128xf32>
      %93 = vector.broadcast %92 : vector<8x1x128xf32> to vector<8x8x128xf32>
      %94 = arith.subf %90, %93 : vector<8x8x128xf32>
      %95 = math.exp %94 : vector<8x8x128xf32>
      %cst_26 = arith.constant dense<0.000000e+00> : vector<8x128xf32>
      %96 = vector.multi_reduction <add>, %95, %cst_26 [1] : vector<8x8x128xf32> to vector<8x128xf32>
      %97 = vector.shape_cast %96 : vector<8x128xf32> to vector<8x1x128xf32>
      %98 = math.log %97 : vector<8x1x128xf32>
      %99 = arith.addf %92, %98 : vector<8x1x128xf32>
      %100 = vector.broadcast %cst_14 : f32 to vector<8x1x128xf32>
      %101 = arith.subf %100, %99 : vector<8x1x128xf32>
      %102 = vector.broadcast %101 : vector<8x1x128xf32> to vector<8x8x128xf32>
      %103 = arith.subf %102, %42 : vector<8x8x128xf32>
      %cst_27 = arith.constant dense<0xFF800000> : vector<8x128xf32>
      %104 = vector.multi_reduction <maximumf>, %103, %cst_27 [0] : vector<8x8x128xf32> to vector<8x128xf32>
      %105 = vector.shape_cast %104 : vector<8x128xf32> to vector<1x8x128xf32>
      %106 = vector.broadcast %105 : vector<1x8x128xf32> to vector<8x8x128xf32>
      %107 = arith.subf %103, %106 : vector<8x8x128xf32>
      %108 = math.exp %107 : vector<8x8x128xf32>
      %cst_28 = arith.constant dense<0.000000e+00> : vector<8x128xf32>
      %109 = vector.multi_reduction <add>, %108, %cst_28 [0] : vector<8x8x128xf32> to vector<8x128xf32>
      %110 = vector.shape_cast %109 : vector<8x128xf32> to vector<1x8x128xf32>
      %111 = math.log %110 : vector<1x8x128xf32>
      %112 = arith.addf %105, %111 : vector<1x8x128xf32>
      %113 = vector.broadcast %cst_15 : f32 to vector<1x8x128xf32>
      %114 = arith.subf %113, %112 : vector<1x8x128xf32>
      scf.yield %101, %114 : vector<8x1x128xf32>, vector<1x8x128xf32>
    }
    %47 = vector.broadcast %46#0 : vector<8x1x128xf32> to vector<8x8x128xf32>
    %48 = vector.broadcast %46#1 : vector<1x8x128xf32> to vector<8x8x128xf32>
    %49 = arith.addf %47, %48 : vector<8x8x128xf32>
    %50 = arith.subf %49, %42 : vector<8x8x128xf32>
    %51 = math.exp %50 : vector<8x8x128xf32>
    %52 = arith.mulf %51, %42 : vector<8x8x128xf32>
    %cst_16 = arith.constant dense<0.000000e+00> : vector<8x128xf32>
    %53 = vector.multi_reduction <add>, %52, %cst_16 [1] : vector<8x8x128xf32> to vector<8x128xf32>
    %54 = vector.shape_cast %53 : vector<8x128xf32> to vector<8x1x128xf32>
    %cst_17 = arith.constant dense<0.000000e+00> : vector<1x128xf32>
    %55 = vector.multi_reduction <add>, %54, %cst_17 [0] : vector<8x1x128xf32> to vector<1x128xf32>
    %56 = vector.shape_cast %55 : vector<1x128xf32> to vector<1x1x128xf32>
    %cst_18 = arith.constant 0.00999999977 : f32
    %57 = vector.broadcast %cst_18 : f32 to vector<1x1x128xf32>
    %58 = arith.mulf %57, %56 : vector<1x1x128xf32>
    %59 = vector.shape_cast %58 : vector<1x1x128xf32> to vector<1x128xf32>
    %60 = vector.shape_cast %59 : vector<1x128xf32> to vector<1x128xf32>
    %61 = vector.broadcast %60 : vector<1x128xf32> to vector<8x128xf32>
    %c0_19 = arith.constant 0 : index
    %c0_20 = arith.constant 0 : index
    %62 = vector.load %arg3[%c0_19, %c0_20] : memref<8x128xf32, #tpu.memory_space<vmem>>, vector<8x128xf32>
    tpu.vector_store %arg3[%c0_19, %c0_20], %61 {strides = array<i32>} : memref<8x128xf32, #tpu.memory_space<vmem>>, vector<8x128xf32>,
    return
  }
  func.func @transform_0(%arg0: i32) -> (i32, i32, i32) {
    %c0_i32 = arith.constant 0 : i32
    %c0_i32_0 = arith.constant 0 : i32
    %c0_i32_1 = arith.constant 0 : i32
    return %c0_i32, %c0_i32_0, %arg0 : i32, i32, i32
  }
  func.func @transform_1(%arg0: i32) -> (i32, i32, i32) {
    %c0_i32 = arith.constant 0 : i32
    %c0_i32_0 = arith.constant 0 : i32
    %c0_i32_1 = arith.constant 0 : i32
    return %c0_i32, %c0_i32_0, %arg0 : i32, i32, i32
  }
  func.func @transform_2(%arg0: i32) -> (i32, i32) {
    %c0_i32 = arith.constant 0 : i32
    %c0_i32_0 = arith.constant 0 : i32
    return %c0_i32, %arg0 : i32, i32
  }
}

</mosaic_0001>

<bundles_post_ra>
// kernel: cos_similarity_w.1
= control target key start
LH: loop header
LB: loop body
LE: loop exit
PB: predicated region body
PF: predicated region fallthrough
CT: control target
= control target key end

     0   :  { %vm30_vm0 = vcmask 1042432   ;;  %s1642_s0 = inlined_call_operand.vmem [shape: f32[8,3,128], index: 0, kind: input, shape index: {}]   ;;  %s1643_s2 = inlined_call_operand.vmem [shape: f32[8,128], index: 2, kind: output, shape index: {}]   ;;  %s1644_s1 = inlined_call_operand.vmem [shape: f32[3,8,128], index: 1, kind: input, shape index: {}]  }
   0x1   :  { %v1058_v0 = vld [vmem:[%s1642_s0] sm:$0x7]  ;;  %v1063_v1 = vld [vmem:[%s1642_s0 + $0x4] sm:$0x7]  ;;  %v1068_v2 = vld [vmem:[%s1642_s0 + $0x8] sm:$0x7] }
   0x2   :  { %v1073_v3 = vld [vmem:[%s1642_s0 + $0xc] sm:$0x7]  ;;  %v1078_v4 = vld [vmem:[%s1642_s0 + $0x10] sm:$0x7]  ;;  %v1083_v5 = vld [vmem:[%s1642_s0 + $0x14] sm:$0x7]  ;;  %v22_v6 = vmul.f32 %v1058_v0, %v1058_v0  ;;  %v23_v7 = vmul.f32 %v1063_v1, %v1063_v1  ;;  %v24_v8 = vmul.f32 %v1068_v2, %v1068_v2 }
   0x3   :  { %v1094_v9 = vld [vmem:[%s1642_s0 + $0x18] sm:$0x7]  ;;  %v1099_v10 = vld [vmem:[%s1642_s0 + $0x1c] sm:$0x7]  ;;  %v25_v11 = vmul.f32 %v1073_v3, %v1073_v3  ;;  %v26_v12 = vmul.f32 %v1078_v4, %v1078_v4  ;;  %v27_v13 = vmul.f32 %v1083_v5, %v1083_v5 }
   0x4   :  { %v28_v14 = vmul.f32 %v1094_v9, %v1094_v9  ;;  %v29_v15 = vmul.f32 %v1099_v10, %v1099_v10  ;;  %v31_v16 = vsel %vm30_vm0, %v22_v6, 0.0  ;;  %v38_v17 = vsel %vm30_vm0, %v23_v7, 0.0 }
   0x5   :  { %v32_v18 = vrot.slane %v31_v16, 4  ;;  %v39_v19 = vrot.slane %v38_v17, 4  ;;  %v45_v20 = vsel %vm30_vm0, %v24_v8, 0.0  ;;  %v52_v21 = vsel %vm30_vm0, %v25_v11, 0.0 }
   0x6   :  { %v46_v22 = vrot.slane %v45_v20, 4  ;;  %v53_v23 = vrot.slane %v52_v21, 4  ;;  %v59_v24 = vsel %vm30_vm0, %v26_v12, 0.0  ;;  %v66_v25 = vsel %vm30_vm0, %v27_v13, 0.0 }
   0x7   :  { %v33_v26 = vadd.f32 %v32_v18, %v31_v16  ;;  %v40_v27 = vadd.f32 %v39_v19, %v38_v17  ;;  %v60_v28 = vrot.slane %v59_v24, 4  ;;  %v67_v29 = vrot.slane %v66_v25, 4  ;;  %v1133_v19 = vld [vmem:[%s1644_s1] sm:$0xff] }
   0x8   :  { %v47_v30 = vadd.f32 %v46_v22, %v45_v20  ;;  %v54_v31 = vadd.f32 %v53_v23, %v52_v21  ;;  %v73_v32 = vsel %vm30_vm0, %v28_v14, 0.0  ;;  %v80_v33 = vsel %vm30_vm0, %v29_v15, 0.0  ;;  %v1138_v20 = vld [vmem:[%s1644_s1 + $0x8] sm:$0xff] }
   0x9   :  { %v34_v34 = vrot.slane %v33_v26, 2  ;;  %v41_v35 = vrot.slane %v40_v27, 2  ;;  %v61_v36 = vadd.f32 %v60_v28, %v59_v24  ;;  %v68_v37 = vadd.f32 %v67_v29, %v66_v25  ;;  %v1157_v28 = vld [vmem:[%s1644_s1 + $0x10] sm:$0xff]  ;;  %s1380_s1 = smov 0  }
   0xa   :  { %v48_v38 = vrot.slane %v47_v30, 2  ;;  %v55_v39 = vrot.slane %v54_v31, 2  ;;  %v74_v40 = vrot.slane %v73_v32, 4  ;;  %v81_v41 = vrot.slane %v80_v33, 4 }
   0xb   :  { %v35_v42 = vadd.f32 %v34_v34, %v33_v26  ;;  %v42_v43 = vadd.f32 %v41_v35, %v40_v27  ;;  %v62_v44 = vrot.slane %v61_v36, 2  ;;  %v69_v45 = vrot.slane %v68_v37, 2 }
   0xc   :  { %v49_v46 = vadd.f32 %v48_v38, %v47_v30  ;;  %v56_v47 = vadd.f32 %v55_v39, %v54_v31  ;;  %v75_v48 = vadd.f32 %v74_v40, %v73_v32  ;;  %v82_v49 = vadd.f32 %v81_v41, %v80_v33 }
   0xd   :  { %v36_v50 = vrot.slane %v35_v42, 1  ;;  %v43_v51 = vrot.slane %v42_v43, 1  ;;  %v63_v52 = vadd.f32 %v62_v44, %v61_v36  ;;  %v70_v53 = vadd.f32 %v69_v45, %v68_v37 }
   0xe   :  { %v50_v54 = vrot.slane %v49_v46, 1  ;;  %v57_v55 = vrot.slane %v56_v47, 1  ;;  %v76_v56 = vrot.slane %v75_v48, 2  ;;  %v83_v57 = vrot.slane %v82_v49, 2 }
   0xf   :  { %v37_v58 = vadd.f32 %v36_v50, %v35_v42  ;;  %v44_v59 = vadd.f32 %v43_v51, %v42_v43  ;;  %v64_v60 = vrot.slane %v63_v52, 1  ;;  %v71_v61 = vrot.slane %v70_v53, 1 }
  0x10   :  { %v51_v62 = vadd.f32 %v50_v54, %v49_v46  ;;  %v58_v63 = vadd.f32 %v57_v55, %v56_v47  ;;  %v77_v6 = vadd.f32 %v76_v56, %v75_v48  ;;  %v84_v7 = vadd.f32 %v83_v57, %v82_v49 }
  0x11   :  { %v65_v8 = vadd.f32 %v64_v60, %v63_v52  ;;  %v72_v11 = vadd.f32 %v71_v61, %v70_v53  ;;  %v1119_v12 = vmax.f32 %v37_v58, 1e-16  ;;  %v1121_v13 = vmax.f32 %v44_v59, 1e-16 }
  0x12   :  { %v78_v14 = vrot.slane %v77_v6, 1  ;;  %v85_v15 = vrot.slane %v84_v7, 1  ;;  %v1123_v16 = vmax.f32 %v51_v62, 1e-16  ;;  %v1125_v17 = vmax.f32 %v58_v63, 1e-16 }
  0x13   :  { %v1127_v18 = vmax.f32 %v65_v8, 1e-16  ;;  %890 = vrsqrt.f32 %v1119_v12  ;;  %v1140_v23 = vmax.f32 %v72_v11, 1e-16  ;;  %v175_v26 = vmul.f32 %v1133_v19, %v1133_v19 }
  0x14   :  { %v79_v21 = vadd.f32 %v78_v14, %v77_v6  ;;  %v86_v22 = vadd.f32 %v85_v15, %v84_v7  ;;  %892 = vrsqrt.f32 %v1121_v13  ;;  %v176_v27 = vmul.f32 %v1138_v20, %v1138_v20 }
  0x15   :  { %894 = vrsqrt.f32 %v1123_v16  ;;  %v177_v34 = vmul.f32 %v1157_v28, %v1157_v28  ;;  %vm101_vm1 = vweird.f32 %v1119_v12  ;;  %vm111_vm2 = vweird.f32 %v1121_v13 }
  0x16   :  { %v1144_v24 = vmax.f32 %v79_v21, 1e-16  ;;  %v1146_v25 = vmax.f32 %v86_v22, 1e-16  ;;  %896 = vrsqrt.f32 %v1125_v17  ;;  %v178_v35 = vadd.f32 %v176_v27, %v175_v26 }
  0x17   :  { %898 = vrsqrt.f32 %v1127_v18  ;;  %vm121_vm3 = vweird.f32 %v1123_v16  ;;  %vm131_vm4 = vweird.f32 %v1125_v17  ;;  %vm141_vm5 = vweird.f32 %v1127_v18 }
  0x18   :  { %900 = vrsqrt.f32 %v1140_v23  ;;  %v179_v49 = vadd.f32 %v178_v35, %v177_v34  ;;  %vm151_vm13 = vweird.f32 %v1140_v23  ;;  %vm161_vm0 = vweird.f32 %v1144_v24 }
  0x19   :  { %v1160_v29 = vpop.eup %890  ;;  %902 = vrsqrt.f32 %v1144_v24 }
  0x1a   :  { %v1163_v30 = vpop.eup %892  ;;  %v96_v31 = vmul.f32 %v1160_v29, %v1119_v12  ;;  %904 = vrsqrt.f32 %v1146_v25  ;;  %vm102_vm6 = vweird.f32 %v1160_v29  ;;  %v1211_v61 = vmax.f32 %v179_v49, 1e-16 }
  0x1b   :  { %v1168_v32 = vpop.eup %894  ;;  %v106_v33 = vmul.f32 %v1163_v30, %v1121_v13  ;;  %vm112_vm7 = vweird.f32 %v1163_v30  ;;  %vm1215_vm9 = vmor %vm101_vm1, %vm102_vm6  ;;  %vm171_vm6 = vweird.f32 %v1146_v25 }
  0x1c   :  { %v1174_v36 = vpop.eup %896  ;;  %v97_v37 = vmul.f32 %v1160_v29, %v96_v31  ;;  %v116_v38 = vmul.f32 %v1168_v32, %v1123_v16  ;;  %vm122_vm8 = vweird.f32 %v1168_v32  ;;  %vm1225_vm11 = vmor %vm111_vm2, %vm112_vm7  ;;  %906 = vrsqrt.f32 %v1211_v61 }
  0x1d   :  { %v1179_v39 = vpop.eup %898  ;;  %v107_v40 = vmul.f32 %v1163_v30, %v106_v33  ;;  %v126_v41 = vmul.f32 %v1174_v36, %v1125_v17  ;;  %vm132_vm10 = vweird.f32 %v1174_v36  ;;  %vm1235_vm14 = vmor %vm121_vm3, %vm122_vm8 }
  0x1e   :  { %v1185_v42 = vpop.eup %900  ;;  %v117_v43 = vmul.f32 %v1168_v32, %v116_v38  ;;  %v136_v44 = vmul.f32 %v1179_v39, %v1127_v18  ;;  %v98_v46 = vmul.f32 0.5, %v97_v37  ;;  %vm142_vm12 = vweird.f32 %v1179_v39  ;;  %vm1249_vm1 = vmor %vm131_vm4, %vm132_vm10 }
  0x1f   :  { %v1192_v45 = vpop.eup %902  ;;  %v127_v47 = vmul.f32 %v1174_v36, %v126_v41  ;;  %v146_v48 = vmul.f32 %v1185_v42, %v1140_v23  ;;  %v108_v51 = vmul.f32 0.5, %v107_v40  ;;  %vm152_vm15 = vweird.f32 %v1185_v42  ;;  %vm1260_vm3 = vmor %vm141_vm5, %vm142_vm12 }
  0x20   :  { %v1197_v50 = vpop.eup %904  ;;  %v118_v52 = vmul.f32 0.5, %v117_v43  ;;  %v137_v53 = vmul.f32 %v1179_v39, %v136_v44  ;;  %v156_v54 = vmul.f32 %v1192_v45, %v1144_v24  ;;  %v99_v62 = vsub.f32 1.5, %v98_v46  ;;  %vm1267_vm4 = vmor %vm151_vm13, %vm152_vm15 }
  0x21   :  { %v128_v55 = vmul.f32 0.5, %v127_v47  ;;  %v147_v56 = vmul.f32 %v1185_v42, %v146_v48  ;;  %v166_v60 = vmul.f32 %v1197_v50, %v1146_v25  ;;  %v109_v63 = vsub.f32 1.5, %v108_v51 }
  0x22   :  { %v138_v57 = vmul.f32 0.5, %v137_v53  ;;  %v157_v58 = vmul.f32 %v1192_v45, %v156_v54  ;;  %v119_v6 = vsub.f32 1.5, %v118_v52  ;;  %v100_v27 = vmul.f32 %v1160_v29, %v99_v62  ;;  %v907_v46 = vpop.eup %906 }
  0x23   :  { %v148_v59 = vmul.f32 0.5, %v147_v56  ;;  %v129_v11 = vsub.f32 1.5, %v128_v55  ;;  %v167_v15 = vmul.f32 %v1197_v50, %v166_v60  ;;  %v110_v31 = vmul.f32 %v1163_v30, %v109_v63 }
  0x24   :  { %v158_v7 = vmul.f32 0.5, %v157_v58  ;;  %v139_v14 = vsub.f32 1.5, %v138_v57  ;;  %v120_v33 = vmul.f32 %v1168_v32, %v119_v6  ;;  %vm162_vm2 = vweird.f32 %v1192_v45 }
  0x25   :  { %v149_v12 = vsub.f32 1.5, %v148_v59  ;;  %v168_v13 = vmul.f32 0.5, %v167_v15  ;;  %v130_v34 = vmul.f32 %v1174_v36, %v129_v11  ;;  %vm172_vm7 = vweird.f32 %v1197_v50  ;;  %vm1276_vm5 = vmor %vm161_vm0, %vm162_vm2 }
  0x26   :  { %v159_v22 = vsub.f32 1.5, %v158_v7  ;;  %v140_v35 = vmul.f32 %v1179_v39, %v139_v14  ;;  %v104_v23 = vsel %vm1215_vm9, %v1160_v29, %v100_v27  ;;  %v114_v43 = vsel %vm1225_vm11, %v1163_v30, %v110_v31  ;;  %vm1296_vm8 = vmor %vm171_vm6, %vm172_vm7 }
  0x27   :  { %v169_v38 = vsub.f32 1.5, %v168_v13  ;;  %v150_v17 = vmul.f32 %v1185_v42, %v149_v12  ;;  %v124_v25 = vsel %vm1235_vm14, %v1168_v32, %v120_v33  ;;  %v134_v24 = vsel %vm1249_vm1, %v1174_v36, %v130_v34 }
  0x28   :  { %v160_v41 = vmul.f32 %v1192_v45, %v159_v22  ;;  %v144_v47 = vsel %vm1260_vm3, %v1179_v39, %v140_v35  ;;  %v182_v48 = vmul.f32 %v907_v46, %v1211_v61  ;;  %v1308_v36 = vmul.f32 %v104_v23, %v1058_v0 }
  0x29   :  { %v170_v44 = vmul.f32 %v1197_v50, %v169_v38  ;;  %v154_v30 = vsel %vm1267_vm4, %v1185_v42, %v150_v17  ;;  %v1311_v49 = vmul.f32 %v114_v43, %v1063_v1  ;;  %v1314_v39 = vmul.f32 %v124_v25, %v1068_v2 }
  0x2a   :  { %v164_v32 = vsel %vm1276_vm5, %v1192_v45, %v160_v41  ;;  %v183_v42 = vmul.f32 %v907_v46, %v182_v48  ;;  %v1320_v52 = vmul.f32 %v134_v24, %v1073_v3  ;;  %v1323_v45 = vmul.f32 %v144_v47, %v1078_v4 }
  0x2b   :  { %v174_v51 = vsel %vm1296_vm8, %v1197_v50, %v170_v44  ;;  %v1326_v0 = vmul.f32 %v154_v30, %v1083_v5  ;;  %v1329_v1 = vmul.f32 %v164_v32, %v1094_v9  ;;  %vm187_vm9 = vweird.f32 %v1211_v61 }
  0x2c   :  { %v184_v53 = vmul.f32 0.5, %v183_v42  ;;  %vm188_vm10 = vweird.f32 %v907_v46  ;;  %v1333_v2 = vmul.f32 %v174_v51, %v1099_v10  ;;  %v202_v50 = vperm.slane %v1308_v36, 0 }
  0x2d   :  { %v203_v3 = vperm.slane %v1311_v49, 0  ;;  %v204_v4 = vperm.slane %v1314_v39, 0  ;;  %v205_v5 = vperm.slane %v1320_v52, 0  ;;  %v206_v55 = vperm.slane %v1323_v45, 0  ;;  %vm189_vm11 = vmor %vm187_vm9, %vm188_vm10 }
  0x2e   :  { %v185_v54 = vsub.f32 1.5, %v184_v53  ;;  %v207_v9 = vperm.slane %v1326_v0, 0  ;;  %v208_v56 = vperm.slane %v1329_v1, 0  ;;  %v218_v57 = vperm.slane %v1308_v36, 1 }
  0x2f   :  { %v219_v10 = vperm.slane %v1311_v49, 1  ;;  %v220_v59 = vperm.slane %v1314_v39, 1  ;;  %v221_v60 = vperm.slane %v1320_v52, 1  ;;  %v222_v61 = vperm.slane %v1323_v45, 1 }
  0x30   :  { %v186_v58 = vmul.f32 %v907_v46, %v185_v54  ;;  %v209_v62 = vperm.slane %v1333_v2, 0  ;;  %v223_v63 = vperm.slane %v1326_v0, 1  ;;  %v224_v6 = vperm.slane %v1329_v1, 1 }
  0x31   :  { %v225_v7 = vperm.slane %v1333_v2, 1  ;;  %v242_v11 = vperm.slane %v1308_v36, 2  ;;  %v243_v14 = vperm.slane %v1311_v49, 2  ;;  %v244_v15 = vperm.slane %v1314_v39, 2 }
  0x32   :  { %v190_v8 = vsel %vm189_vm11, %v907_v46, %v186_v58  ;;  %v245_v22 = vperm.slane %v1320_v52, 2  ;;  %v246_v26 = vperm.slane %v1323_v45, 2  ;;  %v247_v27 = vperm.slane %v1326_v0, 2 }
  0x33   :  { %v199_v21 = vmul.f32 %v190_v8, %v1133_v19  ;;  %v200_v12 = vmul.f32 %v190_v8, %v1138_v20  ;;  %v201_v13 = vmul.f32 %v190_v8, %v1157_v28  ;;  %v248_v31 = vperm.slane %v1329_v1, 2 }
  0x34   :  { %v249_v33 = vperm.slane %v1333_v2, 2 }
  0x35   :  { %v210_v16 = vmul.f32 %v202_v50, %v199_v21  ;;  %v211_v34 = vmul.f32 %v203_v3, %v199_v21  ;;  %v212_v35 = vmul.f32 %v204_v4, %v199_v21  ;;  %v213_v37 = vmul.f32 %v205_v5, %v199_v21 }
  0x36   :  { %v214_v38 = vmul.f32 %v206_v55, %v199_v21  ;;  %v215_v19 = vmul.f32 %v207_v9, %v199_v21  ;;  %v216_v17 = vmul.f32 %v208_v56, %v199_v21  ;;  %v217_v20 = vmul.f32 %v209_v62, %v199_v21 }
  0x37   :  { %v226_v40 = vmul.f32 %v218_v57, %v200_v12  ;;  %v227_v41 = vmul.f32 %v219_v10, %v200_v12  ;;  %v228_v18 = vmul.f32 %v220_v59, %v200_v12  ;;  %v229_v23 = vmul.f32 %v221_v60, %v200_v12 }
  0x38   :  { %v230_v43 = vmul.f32 %v222_v61, %v200_v12  ;;  %v231_v28 = vmul.f32 %v223_v63, %v200_v12  ;;  %v232_v25 = vmul.f32 %v224_v6, %v200_v12  ;;  %v233_v44 = vmul.f32 %v225_v7, %v200_v12 }
  0x39   :  { %v234_v46 = vadd.f32 %v226_v40, %v210_v16  ;;  %v235_v24 = vadd.f32 %v227_v41, %v211_v34  ;;  %v236_v47 = vadd.f32 %v228_v18, %v212_v35  ;;  %v237_v29 = vadd.f32 %v229_v23, %v213_v37 }
  0x3a   :  { %v238_v30 = vadd.f32 %v230_v43, %v214_v38  ;;  %v239_v32 = vadd.f32 %v231_v28, %v215_v19  ;;  %v240_v48 = vadd.f32 %v232_v25, %v216_v17  ;;  %v241_v36 = vadd.f32 %v233_v44, %v217_v20 }
  0x3b   :  { %v250_v49 = vmul.f32 %v242_v11, %v201_v13  ;;  %v251_v39 = vmul.f32 %v243_v14, %v201_v13  ;;  %v252_v51 = vmul.f32 %v244_v15, %v201_v13  ;;  %v253_v42 = vmul.f32 %v245_v22, %v201_v13 }
  0x3c   :  { %v254_v52 = vmul.f32 %v246_v26, %v201_v13  ;;  %v255_v45 = vmul.f32 %v247_v27, %v201_v13  ;;  %v256_v0 = vmul.f32 %v248_v31, %v201_v13  ;;  %v257_v1 = vmul.f32 %v249_v33, %v201_v13 }
  0x3d   :  { %v258_v53 = vadd.f32 %v250_v49, %v234_v46  ;;  %v259_v2 = vadd.f32 %v251_v39, %v235_v24  ;;  %v260_v50 = vadd.f32 %v252_v51, %v236_v47  ;;  %v261_v3 = vadd.f32 %v253_v42, %v237_v29 }
  0x3e   :  { %v262_v54 = vadd.f32 %v254_v52, %v238_v30  ;;  %v263_v4 = vadd.f32 %v255_v45, %v239_v32  ;;  %v264_v5 = vadd.f32 %v256_v0, %v240_v48  ;;  %v265_v55 = vadd.f32 %v257_v1, %v241_v36 }
  0x3f   :  { %v866_v9 = vclamps-f32 %v258_v53, 1.0  ;;  %v867_v56 = vclamps-f32 %v259_v2, 1.0  ;;  %v868_v57 = vclamps-f32 %v260_v50, 1.0  ;;  %v869_v10 = vclamps-f32 %v261_v3, 1.0 }
  0x40   :  { %v870_v58 = vclamps-f32 %v262_v54, 1.0  ;;  %v871_v59 = vclamps-f32 %v263_v4, 1.0  ;;  %v872_v60 = vclamps-f32 %v264_v5, 1.0  ;;  %v873_v61 = vclamps-f32 %v265_v55, 1.0 }
  0x41   :  { %v282_v62 = vsub.f32 1.0, %v866_v9  ;;  %v283_v63 = vsub.f32 1.0, %v867_v56  ;;  %v284_v6 = vsub.f32 1.0, %v868_v57  ;;  %v285_v7 = vsub.f32 1.0, %v869_v10 }
  0x42   :  { %v286_v8 = vsub.f32 1.0, %v870_v58  ;;  %v287_v11 = vsub.f32 1.0, %v871_v59  ;;  %v288_v14 = vsub.f32 1.0, %v872_v60  ;;  %v289_v15 = vsub.f32 1.0, %v873_v61 }
  0x43   :  { %v1362_v21 = vmul.f32 100.0, %v282_v62  ;;  %v1364_v12 = vmul.f32 100.0, %v283_v63  ;;  %v1366_v22 = vmul.f32 100.0, %v284_v6  ;;  %v1368_v26 = vmul.f32 100.0, %v285_v7 }
  0x44   :  { %v1370_v13 = vmul.f32 100.0, %v286_v8  ;;  %v1372_v27 = vmul.f32 100.0, %v287_v11  ;;  %v1374_v31 = vmul.f32 100.0, %v288_v14  ;;  %v1376_v33 = vmul.f32 100.0, %v289_v15 }
  0x45   :  { %v1378_v16 = vmov 0.0  }
  0x46 LB: > { %v1387_v34 = vsub.f32 %v1034_v16, %v1362_v21  ;;  %v1390_v35 = vsub.f32 %v1034_v16, %v1364_v12  ;;  %v1393_v37 = vsub.f32 %v1034_v16, %v1366_v22  ;;  %v1396_v38 = vsub.f32 %v1034_v16, %v1368_v26  ;;  %s303_s1 = sadd.s32 1, %s1038_s1   ;;  %s1038_s1 = sphi %s1380_s1, %s303_s1   ;;  %v1034_v16 = vphi %v1378_v16, %v1661_v16  }
  0x47   : > { %v1399_v19 = vsub.f32 %v1034_v16, %v1370_v13  ;;  %v1402_v17 = vsub.f32 %v1034_v16, %v1372_v27  ;;  %v1405_v20 = vsub.f32 %v1034_v16, %v1374_v31  ;;  %v1408_v40 = vsub.f32 %v1034_v16, %v1376_v33  ;;  %p300_p0 = scmp.ge.s32.totalorder %s303_s1, 250  }
  0x48   : > { %v321_v41 = vrot.slane %v1387_v34, 4  ;;  %v327_v18 = vrot.slane %v1390_v35, 4  ;;  %v333_v23 = vrot.slane %v1393_v37, 4  ;;  %v339_v43 = vrot.slane %v1396_v38, 4 }
  0x49   : > { %v345_v28 = vrot.slane %v1399_v19, 4  ;;  %v351_v25 = vrot.slane %v1402_v17, 4  ;;  %v357_v44 = vrot.slane %v1405_v20, 4  ;;  %v363_v46 = vrot.slane %v1408_v40, 4 }
  0x4a   : > { %v322_v24 = vmax.f32 %v1387_v34, %v321_v41  ;;  %v328_v47 = vmax.f32 %v1390_v35, %v327_v18  ;;  %v334_v29 = vmax.f32 %v1393_v37, %v333_v23  ;;  %v340_v30 = vmax.f32 %v1396_v38, %v339_v43 }
  0x4b   : > { %v346_v32 = vmax.f32 %v1399_v19, %v345_v28  ;;  %v352_v48 = vmax.f32 %v1402_v17, %v351_v25  ;;  %v358_v36 = vmax.f32 %v1405_v20, %v357_v44  ;;  %v364_v49 = vmax.f32 %v1408_v40, %v363_v46 }
  0x4c   : > { %v323_v39 = vrot.slane %v322_v24, 2  ;;  %v329_v51 = vrot.slane %v328_v47, 2  ;;  %v335_v42 = vrot.slane %v334_v29, 2  ;;  %v341_v52 = vrot.slane %v340_v30, 2 }
  0x4d   : > { %v347_v45 = vrot.slane %v346_v32, 2  ;;  %v353_v0 = vrot.slane %v352_v48, 2  ;;  %v359_v1 = vrot.slane %v358_v36, 2  ;;  %v365_v53 = vrot.slane %v364_v49, 2 }
  0x4e   : > { %v324_v2 = vmax.f32 %v322_v24, %v323_v39  ;;  %v330_v50 = vmax.f32 %v328_v47, %v329_v51  ;;  %v336_v3 = vmax.f32 %v334_v29, %v335_v42  ;;  %v342_v54 = vmax.f32 %v340_v30, %v341_v52 }
  0x4f   : > { %v348_v4 = vmax.f32 %v346_v32, %v347_v45  ;;  %v354_v5 = vmax.f32 %v352_v48, %v353_v0  ;;  %v360_v55 = vmax.f32 %v358_v36, %v359_v1  ;;  %v366_v9 = vmax.f32 %v364_v49, %v365_v53 }
  0x50   : > { %v325_v56 = vrot.slane %v324_v2, 1  ;;  %v331_v57 = vrot.slane %v330_v50, 1  ;;  %v337_v10 = vrot.slane %v336_v3, 1  ;;  %v343_v58 = vrot.slane %v342_v54, 1 }
  0x51   : > { %v349_v59 = vrot.slane %v348_v4, 1  ;;  %v355_v60 = vrot.slane %v354_v5, 1  ;;  %v361_v61 = vrot.slane %v360_v55, 1  ;;  %v367_v62 = vrot.slane %v366_v9, 1 }
  0x52   : > { %v1426_v63 = vmax.f32 %v324_v2, %v325_v56  ;;  %v1428_v6 = vmax.f32 %v330_v50, %v331_v57  ;;  %v1430_v7 = vmax.f32 %v336_v3, %v337_v10  ;;  %v1432_v8 = vmax.f32 %v342_v54, %v343_v58 }
  0x53   : > { %v1434_v11 = vmax.f32 %v348_v4, %v349_v59  ;;  %v1436_v14 = vmax.f32 %v354_v5, %v355_v60  ;;  %v1438_v15 = vmax.f32 %v360_v55, %v361_v61  ;;  %v1440_v16 = vmax.f32 %v366_v9, %v367_v62 }
  0x54   : > { %v369_v41 = vsub.f32 %v1387_v34, %v1426_v63  ;;  %v370_v18 = vsub.f32 %v1390_v35, %v1428_v6  ;;  %v371_v23 = vsub.f32 %v1393_v37, %v1430_v7  ;;  %v372_v43 = vsub.f32 %v1396_v38, %v1432_v8 }
  0x55   : > { %v373_v28 = vsub.f32 %v1399_v19, %v1434_v11  ;;  %v374_v25 = vsub.f32 %v1402_v17, %v1436_v14  ;;  %v375_v44 = vsub.f32 %v1405_v20, %v1438_v15  ;;  %v376_v35 = vsub.f32 %v1408_v40, %v1440_v16 }
  0x56   : > { %v377_v46 = vmul.f32 1.442695, %v369_v41  ;;  %v379_v34 = vmul.f32 1.442695, %v370_v18  ;;  %v381_v24 = vmul.f32 1.442695, %v371_v23 }
  0x57   : > { %v383_v47 = vmul.f32 1.442695, %v372_v43  ;;  %v385_v37 = vmul.f32 1.442695, %v373_v28  ;;  %v387_v38 = vmul.f32 1.442695, %v374_v25 }
  0x58   : > { %908 = vpow2.f32 %v377_v46  ;;  %v389_v29 = vmul.f32 1.442695, %v375_v44  ;;  %v391_v19 = vmul.f32 1.442695, %v376_v35 }
  0x59   : > { %910 = vpow2.f32 %v379_v34 }
  0x5a   : > { %912 = vpow2.f32 %v381_v24 }
  0x5b   : > { %914 = vpow2.f32 %v383_v47 }
  0x5c   : > { %916 = vpow2.f32 %v385_v37 }
  0x5d   : > { %918 = vpow2.f32 %v387_v38 }
  0x5e   : > { %v909_v17 = vpop.eup %908  ;;  %920 = vpow2.f32 %v389_v29 }
  0x5f   : > { %v911_v20 = vpop.eup %910  ;;  %922 = vpow2.f32 %v391_v19  ;;  %v393_v30 = vrot.slane %v909_v17, 4 }
  0x60   : > { %v913_v32 = vpop.eup %912  ;;  %v399_v48 = vrot.slane %v911_v20, 4 }
  0x61   : > { %v915_v36 = vpop.eup %914  ;;  %v394_v40 = vadd.f32 %v909_v17, %v393_v30  ;;  %v405_v49 = vrot.slane %v913_v32, 4 }
  0x62   : > { %v917_v39 = vpop.eup %916  ;;  %v400_v51 = vadd.f32 %v911_v20, %v399_v48  ;;  %v411_v42 = vrot.slane %v915_v36, 4 }
  0x63   : > { %v919_v52 = vpop.eup %918  ;;  %v395_v45 = vrot.slane %v394_v40, 2  ;;  %v406_v0 = vadd.f32 %v913_v32, %v405_v49  ;;  %v417_v1 = vrot.slane %v917_v39, 4 }
  0x64   : > { %v921_v53 = vpop.eup %920  ;;  %v401_v2 = vrot.slane %v400_v51, 2  ;;  %v412_v50 = vadd.f32 %v915_v36, %v411_v42  ;;  %v423_v3 = vrot.slane %v919_v52, 4 }
  0x65   : > { %v923_v54 = vpop.eup %922  ;;  %v396_v4 = vadd.f32 %v395_v45, %v394_v40  ;;  %v407_v5 = vrot.slane %v406_v0, 2  ;;  %v418_v55 = vadd.f32 %v917_v39, %v417_v1  ;;  %v429_v9 = vrot.slane %v921_v53, 4 }
  0x66   : > { %v402_v56 = vadd.f32 %v401_v2, %v400_v51  ;;  %v413_v57 = vrot.slane %v412_v50, 2  ;;  %v424_v10 = vadd.f32 %v919_v52, %v423_v3  ;;  %v435_v58 = vrot.slane %v923_v54, 4 }
  0x67   : > { %v397_v59 = vrot.slane %v396_v4, 1  ;;  %v408_v60 = vadd.f32 %v407_v5, %v406_v0  ;;  %v419_v61 = vrot.slane %v418_v55, 2  ;;  %v430_v62 = vadd.f32 %v921_v53, %v429_v9 }
  0x68   : > { %v403_v41 = vrot.slane %v402_v56, 1  ;;  %v414_v18 = vadd.f32 %v413_v57, %v412_v50  ;;  %v425_v23 = vrot.slane %v424_v10, 2  ;;  %v436_v43 = vadd.f32 %v923_v54, %v435_v58 }
  0x69   : > { %v398_v28 = vadd.f32 %v397_v59, %v396_v4  ;;  %v409_v25 = vrot.slane %v408_v60, 1  ;;  %v420_v44 = vadd.f32 %v419_v61, %v418_v55  ;;  %v431_v46 = vrot.slane %v430_v62, 2 }
  0x6a   : > { %v404_v34 = vadd.f32 %v403_v41, %v402_v56  ;;  %v415_v24 = vrot.slane %v414_v18, 1  ;;  %v426_v35 = vadd.f32 %v425_v23, %v424_v10  ;;  %v437_v47 = vrot.slane %v436_v43, 2 }
  0x6b   : > { %v410_v37 = vadd.f32 %v409_v25, %v408_v60  ;;  %v421_v38 = vrot.slane %v420_v44, 1  ;;  %v432_v29 = vadd.f32 %v431_v46, %v430_v62  ;;  %924 = vlog2.f32 %v398_v28 }
  0x6c   : > { %v416_v19 = vadd.f32 %v415_v24, %v414_v18  ;;  %v427_v17 = vrot.slane %v426_v35, 1  ;;  %v438_v20 = vadd.f32 %v437_v47, %v436_v43  ;;  %926 = vlog2.f32 %v404_v34 }
  0x6d   : > { %v422_v30 = vadd.f32 %v421_v38, %v420_v44  ;;  %v433_v32 = vrot.slane %v432_v29, 1  ;;  %928 = vlog2.f32 %v410_v37 }
  0x6e   : > { %v428_v48 = vadd.f32 %v427_v17, %v426_v35  ;;  %v439_v36 = vrot.slane %v438_v20, 1  ;;  %930 = vlog2.f32 %v416_v19 }
  0x6f   : > { %v434_v40 = vadd.f32 %v433_v32, %v432_v29  ;;  %932 = vlog2.f32 %v422_v30 }
  0x70   : > { %v440_v49 = vadd.f32 %v439_v36, %v438_v20  ;;  %934 = vlog2.f32 %v428_v48 }
  0x71   : > { %v925_v39 = vpop.eup %924  ;;  %936 = vlog2.f32 %v434_v40 }
  0x72   : > { %v927_v51 = vpop.eup %926  ;;  %v442_v42 = vmul.f32 0.6931472, %v925_v39  ;;  %938 = vlog2.f32 %v440_v49 }
  0x73   : > { %v929_v52 = vpop.eup %928  ;;  %v444_v45 = vmul.f32 0.6931472, %v927_v51 }
  0x74   : > { %v931_v0 = vpop.eup %930  ;;  %v446_v1 = vmul.f32 0.6931472, %v929_v52  ;;  %v457_v53 = vadd.f32 %v442_v42, %v1426_v63 }
  0x75   : > { %v933_v2 = vpop.eup %932  ;;  %v448_v50 = vmul.f32 0.6931472, %v931_v0  ;;  %v458_v3 = vadd.f32 %v444_v45, %v1428_v6 }
  0x76   : > { %v935_v54 = vpop.eup %934  ;;  %v450_v4 = vmul.f32 0.6931472, %v933_v2  ;;  %v459_v5 = vadd.f32 %v446_v1, %v1430_v7  ;;  %v465_v55 = vsub.f32 -2.0794415, %v457_v53 }
  0x77   : > { %v937_v9 = vpop.eup %936  ;;  %v452_v56 = vmul.f32 0.6931472, %v935_v54  ;;  %v460_v57 = vadd.f32 %v448_v50, %v1432_v8  ;;  %v466_v10 = vsub.f32 -2.0794415, %v458_v3 }
  0x78   : > { %v939_v58 = vpop.eup %938  ;;  %v454_v59 = vmul.f32 0.6931472, %v937_v9  ;;  %v461_v60 = vadd.f32 %v450_v4, %v1434_v11  ;;  %v467_v61 = vsub.f32 -2.0794415, %v459_v5  ;;  %v473_v7 = vsub.f32 %v465_v55, %v1362_v21 }
  0x79   : > { %v456_v63 = vmul.f32 0.6931472, %v939_v58  ;;  %v462_v62 = vadd.f32 %v452_v56, %v1436_v14  ;;  %v468_v41 = vsub.f32 -2.0794415, %v460_v57  ;;  %v474_v8 = vsub.f32 %v466_v10, %v1364_v12 }
  0x7a   : > { %v463_v6 = vadd.f32 %v454_v59, %v1438_v15  ;;  %v469_v18 = vsub.f32 -2.0794415, %v461_v60  ;;  %v475_v25 = vsub.f32 %v467_v61, %v1366_v22 }
  0x7b   : > { %v464_v23 = vadd.f32 %v456_v63, %v1440_v16  ;;  %v470_v43 = vsub.f32 -2.0794415, %v462_v62  ;;  %v476_v46 = vsub.f32 %v468_v41, %v1368_v26 }
  0x7c   : > { %v471_v28 = vsub.f32 -2.0794415, %v463_v6  ;;  %v477_v11 = vsub.f32 %v469_v18, %v1370_v13 }
  0x7d   : > { %v472_v44 = vsub.f32 -2.0794415, %v464_v23  ;;  %v478_v14 = vsub.f32 %v470_v43, %v1372_v27 }
  0x7e   : > { %v479_v15 = vsub.f32 %v471_v28, %v1374_v31  ;;  %v481_v34 = vmax.f32 %v473_v7, %v477_v11 }
  0x7f   : > { %v480_v24 = vsub.f32 %v472_v44, %v1376_v33  ;;  %v482_v35 = vmax.f32 %v474_v8, %v478_v14 }
  0x80   : > { %v483_v16 = vmax.f32 %v475_v25, %v479_v15 }
  0x81   : > { %v484_v47 = vmax.f32 %v476_v46, %v480_v24  ;;  %v485_v37 = vmax.f32 %v481_v34, %v482_v35 }
  0x83   : > { %v486_v38 = vmax.f32 %v483_v16, %v484_v47 }
  0x85   : > { %v487_v29 = vmax.f32 %v485_v37, %v486_v38 }
  0x87   : > { %v488_v19 = vsub.f32 %v473_v7, %v487_v29  ;;  %v489_v17 = vsub.f32 %v474_v8, %v487_v29  ;;  %v490_v20 = vsub.f32 %v475_v25, %v487_v29  ;;  %v491_v30 = vsub.f32 %v476_v46, %v487_v29 }
  0x88   : > { %v492_v32 = vsub.f32 %v477_v11, %v487_v29  ;;  %v493_v49 = vsub.f32 %v478_v14, %v487_v29  ;;  %v494_v51 = vsub.f32 %v479_v15, %v487_v29  ;;  %v495_v52 = vsub.f32 %v480_v24, %v487_v29 }
  0x89   : > { %v496_v48 = vmul.f32 1.442695, %v488_v19  ;;  %v498_v36 = vmul.f32 1.442695, %v489_v17  ;;  %v500_v40 = vmul.f32 1.442695, %v490_v20 }
  0x8a   : > { %v502_v39 = vmul.f32 1.442695, %v491_v30  ;;  %v504_v42 = vmul.f32 1.442695, %v492_v32  ;;  %v506_v45 = vmul.f32 1.442695, %v493_v49 }
  0x8b   : > { %940 = vpow2.f32 %v496_v48  ;;  %v508_v0 = vmul.f32 1.442695, %v494_v51  ;;  %v510_v2 = vmul.f32 1.442695, %v495_v52 }
  0x8c   : > { %942 = vpow2.f32 %v498_v36 }
  0x8d   : > { %944 = vpow2.f32 %v500_v40 }
  0x8e   : > { %946 = vpow2.f32 %v502_v39 }
  0x8f   : > { %948 = vpow2.f32 %v504_v42 }
  0x90   : > { %950 = vpow2.f32 %v506_v45 }
  0x91   : > { %v941_v1 = vpop.eup %940  ;;  %952 = vpow2.f32 %v508_v0 }
  0x92   : > { %v943_v53 = vpop.eup %942  ;;  %954 = vpow2.f32 %v510_v2 }
  0x93   : > { %v945_v50 = vpop.eup %944  ;;  %v512_v3 = vadd.f32 %v943_v53, %v941_v1 }
  0x94   : > { %v947_v54 = vpop.eup %946 }
  0x95   : > { %v513_v4 = vadd.f32 %v945_v50, %v512_v3  ;;  %v949_v5 = vpop.eup %948 }
  0x96   : > { %v951_v9 = vpop.eup %950 }
  0x97   : > { %v514_v55 = vadd.f32 %v947_v54, %v513_v4  ;;  %v953_v57 = vpop.eup %952 }
  0x98   : > { %v955_v58 = vpop.eup %954 }
  0x99   : > { %v515_v56 = vadd.f32 %v949_v5, %v514_v55 }
  0x9b   : > { %v516_v10 = vadd.f32 %v951_v9, %v515_v56 }
  0x9d   : > { %v517_v59 = vadd.f32 %v953_v57, %v516_v10 }
  0x9f   : > { %v518_v60 = vadd.f32 %v955_v58, %v517_v59 }
  0xa1   : > { %956 = vlog2.f32 %v518_v60 }
  0xa7   : > { %v957_v61 = vpop.eup %956 }
  0xa8   : > { %v520_v63 = vmul.f32 0.6931472, %v957_v61 }
  0xaa   : > { %v521_v62 = vadd.f32 %v520_v63, %v487_v29 }
  0xac   : > { %v522_v41 = vsub.f32 -2.0794415, %v521_v62 }
  0xae   : > { %v1475_v6 = vsub.f32 %v522_v41, %v1362_v21  ;;  %v1478_v18 = vsub.f32 %v522_v41, %v1364_v12  ;;  %v1481_v7 = vsub.f32 %v522_v41, %v1366_v22  ;;  %v1484_v23 = vsub.f32 %v522_v41, %v1368_v26 }
  0xaf   : > { %v1487_v43 = vsub.f32 %v522_v41, %v1370_v13  ;;  %v1490_v8 = vsub.f32 %v522_v41, %v1372_v27  ;;  %v1493_v28 = vsub.f32 %v522_v41, %v1374_v31  ;;  %v1496_v25 = vsub.f32 %v522_v41, %v1376_v33 }
  0xb0   : > { %v531_v11 = vrot.slane %v1475_v6, 4  ;;  %v537_v44 = vrot.slane %v1478_v18, 4  ;;  %v543_v46 = vrot.slane %v1481_v7, 4  ;;  %v549_v14 = vrot.slane %v1484_v23, 4 }
  0xb1   : > { %v555_v15 = vrot.slane %v1487_v43, 4  ;;  %v561_v34 = vrot.slane %v1490_v8, 4  ;;  %v567_v24 = vrot.slane %v1493_v28, 4  ;;  %v573_v35 = vrot.slane %v1496_v25, 4 }
  0xb2   : > { %v532_v16 = vmax.f32 %v1475_v6, %v531_v11  ;;  %v538_v47 = vmax.f32 %v1478_v18, %v537_v44  ;;  %v544_v37 = vmax.f32 %v1481_v7, %v543_v46  ;;  %v550_v38 = vmax.f32 %v1484_v23, %v549_v14 }
  0xb3   : > { %v556_v29 = vmax.f32 %v1487_v43, %v555_v15  ;;  %v562_v19 = vmax.f32 %v1490_v8, %v561_v34  ;;  %v568_v17 = vmax.f32 %v1493_v28, %v567_v24  ;;  %v574_v20 = vmax.f32 %v1496_v25, %v573_v35 }
  0xb4   : > { %v533_v30 = vrot.slane %v532_v16, 2  ;;  %v539_v32 = vrot.slane %v538_v47, 2  ;;  %v545_v48 = vrot.slane %v544_v37, 2  ;;  %v551_v36 = vrot.slane %v550_v38, 2 }
  0xb5   : > { %v557_v40 = vrot.slane %v556_v29, 2  ;;  %v563_v49 = vrot.slane %v562_v19, 2  ;;  %v569_v39 = vrot.slane %v568_v17, 2  ;;  %v575_v51 = vrot.slane %v574_v20, 2 }
  0xb6   : > { %v534_v42 = vmax.f32 %v532_v16, %v533_v30  ;;  %v540_v52 = vmax.f32 %v538_v47, %v539_v32  ;;  %v546_v45 = vmax.f32 %v544_v37, %v545_v48  ;;  %v552_v0 = vmax.f32 %v550_v38, %v551_v36 }
  0xb7   : > { %v558_v1 = vmax.f32 %v556_v29, %v557_v40  ;;  %v564_v53 = vmax.f32 %v562_v19, %v563_v49  ;;  %v570_v2 = vmax.f32 %v568_v17, %v569_v39  ;;  %v576_v50 = vmax.f32 %v574_v20, %v575_v51 }
  0xb8   : > { %v535_v3 = vrot.slane %v534_v42, 1  ;;  %v541_v54 = vrot.slane %v540_v52, 1  ;;  %v547_v4 = vrot.slane %v546_v45, 1  ;;  %v553_v5 = vrot.slane %v552_v0, 1 }
  0xb9   : > { %v559_v55 = vrot.slane %v558_v1, 1  ;;  %v565_v9 = vrot.slane %v564_v53, 1  ;;  %v571_v56 = vrot.slane %v570_v2, 1  ;;  %v577_v57 = vrot.slane %v576_v50, 1 }
  0xba   : > { %v1514_v10 = vmax.f32 %v534_v42, %v535_v3  ;;  %v1516_v58 = vmax.f32 %v540_v52, %v541_v54  ;;  %v1518_v59 = vmax.f32 %v546_v45, %v547_v4  ;;  %v1520_v60 = vmax.f32 %v552_v0, %v553_v5 }
  0xbb   : > { %v1522_v61 = vmax.f32 %v558_v1, %v559_v55  ;;  %v1524_v63 = vmax.f32 %v564_v53, %v565_v9  ;;  %v1526_v62 = vmax.f32 %v570_v2, %v571_v56  ;;  %v1528_v41 = vmax.f32 %v576_v50, %v577_v57 }
  0xbc   : > { %v579_v11 = vsub.f32 %v1475_v6, %v1514_v10  ;;  %v580_v44 = vsub.f32 %v1478_v18, %v1516_v58  ;;  %v581_v46 = vsub.f32 %v1481_v7, %v1518_v59  ;;  %v582_v14 = vsub.f32 %v1484_v23, %v1520_v60 }
  0xbd   : > { %v583_v15 = vsub.f32 %v1487_v43, %v1522_v61  ;;  %v584_v34 = vsub.f32 %v1490_v8, %v1524_v63  ;;  %v585_v24 = vsub.f32 %v1493_v28, %v1526_v62  ;;  %v586_v18 = vsub.f32 %v1496_v25, %v1528_v41 }
  0xbe   : > { %v587_v35 = vmul.f32 1.442695, %v579_v11  ;;  %v589_v6 = vmul.f32 1.442695, %v580_v44  ;;  %v591_v16 = vmul.f32 1.442695, %v581_v46 }
  0xbf   : > { %v593_v47 = vmul.f32 1.442695, %v582_v14  ;;  %v595_v7 = vmul.f32 1.442695, %v583_v15  ;;  %v597_v23 = vmul.f32 1.442695, %v584_v34 }
  0xc0   : > { %958 = vpow2.f32 %v587_v35  ;;  %v599_v37 = vmul.f32 1.442695, %v585_v24  ;;  %v601_v43 = vmul.f32 1.442695, %v586_v18 }
  0xc1   : > { %960 = vpow2.f32 %v589_v6 }
  0xc2   : > { %962 = vpow2.f32 %v591_v16 }
  0xc3   : > { %964 = vpow2.f32 %v593_v47 }
  0xc4   : > { %966 = vpow2.f32 %v595_v7 }
  0xc5   : > { %968 = vpow2.f32 %v597_v23 }
  0xc6   : > { %v959_v8 = vpop.eup %958  ;;  %970 = vpow2.f32 %v599_v37 }
  0xc7   : > { %v961_v28 = vpop.eup %960  ;;  %972 = vpow2.f32 %v601_v43  ;;  %v603_v38 = vrot.slane %v959_v8, 4 }
  0xc8   : > { %v963_v29 = vpop.eup %962  ;;  %v609_v19 = vrot.slane %v961_v28, 4 }
  0xc9   : > { %v965_v17 = vpop.eup %964  ;;  %v604_v25 = vadd.f32 %v959_v8, %v603_v38  ;;  %v615_v20 = vrot.slane %v963_v29, 4 }
  0xca   : > { %v967_v30 = vpop.eup %966  ;;  %v610_v32 = vadd.f32 %v961_v28, %v609_v19  ;;  %v621_v48 = vrot.slane %v965_v17, 4 }
  0xcb   : > { %v969_v36 = vpop.eup %968  ;;  %v605_v40 = vrot.slane %v604_v25, 2  ;;  %v616_v49 = vadd.f32 %v963_v29, %v615_v20  ;;  %v627_v39 = vrot.slane %v967_v30, 4 }
  0xcc   : > { %v971_v51 = vpop.eup %970  ;;  %v611_v42 = vrot.slane %v610_v32, 2  ;;  %v622_v52 = vadd.f32 %v965_v17, %v621_v48  ;;  %v633_v45 = vrot.slane %v969_v36, 4 }
  0xcd   : > { %v973_v0 = vpop.eup %972  ;;  %v606_v1 = vadd.f32 %v605_v40, %v604_v25  ;;  %v617_v53 = vrot.slane %v616_v49, 2  ;;  %v628_v2 = vadd.f32 %v967_v30, %v627_v39  ;;  %v639_v50 = vrot.slane %v971_v51, 4 }
  0xce   : > { %v612_v3 = vadd.f32 %v611_v42, %v610_v32  ;;  %v623_v54 = vrot.slane %v622_v52, 2  ;;  %v634_v4 = vadd.f32 %v969_v36, %v633_v45  ;;  %v645_v5 = vrot.slane %v973_v0, 4 }
  0xcf   : > { %v607_v55 = vrot.slane %v606_v1, 1  ;;  %v618_v9 = vadd.f32 %v617_v53, %v616_v49  ;;  %v629_v56 = vrot.slane %v628_v2, 2  ;;  %v640_v57 = vadd.f32 %v971_v51, %v639_v50 }
  0xd0   : > { %v613_v11 = vrot.slane %v612_v3, 1  ;;  %v624_v44 = vadd.f32 %v623_v54, %v622_v52  ;;  %v635_v46 = vrot.slane %v634_v4, 2  ;;  %v646_v14 = vadd.f32 %v973_v0, %v645_v5 }
  0xd1   : > { %v608_v15 = vadd.f32 %v607_v55, %v606_v1  ;;  %v619_v34 = vrot.slane %v618_v9, 1  ;;  %v630_v24 = vadd.f32 %v629_v56, %v628_v2  ;;  %v641_v35 = vrot.slane %v640_v57, 2 }
  0xd2   : > { %v614_v6 = vadd.f32 %v613_v11, %v612_v3  ;;  %v625_v16 = vrot.slane %v624_v44, 1  ;;  %v636_v18 = vadd.f32 %v635_v46, %v634_v4  ;;  %v647_v47 = vrot.slane %v646_v14, 2 }
  0xd3   : > { %v620_v7 = vadd.f32 %v619_v34, %v618_v9  ;;  %v631_v23 = vrot.slane %v630_v24, 1  ;;  %v642_v37 = vadd.f32 %v641_v35, %v640_v57  ;;  %974 = vlog2.f32 %v608_v15 }
  0xd4   : > { %v626_v43 = vadd.f32 %v625_v16, %v624_v44  ;;  %v637_v8 = vrot.slane %v636_v18, 1  ;;  %v648_v28 = vadd.f32 %v647_v47, %v646_v14  ;;  %976 = vlog2.f32 %v614_v6 }
  0xd5   : > { %v632_v38 = vadd.f32 %v631_v23, %v630_v24  ;;  %v643_v29 = vrot.slane %v642_v37, 1  ;;  %978 = vlog2.f32 %v620_v7 }
  0xd6   : > { %v638_v19 = vadd.f32 %v637_v8, %v636_v18  ;;  %v649_v17 = vrot.slane %v648_v28, 1  ;;  %980 = vlog2.f32 %v626_v43 }
  0xd7   : > { %v644_v25 = vadd.f32 %v643_v29, %v642_v37  ;;  %982 = vlog2.f32 %v632_v38 }
  0xd8   : > { %v650_v20 = vadd.f32 %v649_v17, %v648_v28  ;;  %984 = vlog2.f32 %v638_v19 }
  0xd9   : > { %v975_v30 = vpop.eup %974  ;;  %986 = vlog2.f32 %v644_v25 }
  0xda   : > { %v977_v32 = vpop.eup %976  ;;  %v652_v48 = vmul.f32 0.6931472, %v975_v30  ;;  %988 = vlog2.f32 %v650_v20 }
  0xdb   : > { %v979_v36 = vpop.eup %978  ;;  %v654_v40 = vmul.f32 0.6931472, %v977_v32 }
  0xdc   : > { %v981_v49 = vpop.eup %980  ;;  %v656_v39 = vmul.f32 0.6931472, %v979_v36  ;;  %v1547_v51 = vadd.f32 %v652_v48, %v1514_v10 }
  0xdd   : > { %v983_v42 = vpop.eup %982  ;;  %v658_v52 = vmul.f32 0.6931472, %v981_v49  ;;  %v1550_v45 = vadd.f32 %v654_v40, %v1516_v58 }
  0xde   : > { %v985_v0 = vpop.eup %984  ;;  %v660_v1 = vmul.f32 0.6931472, %v983_v42  ;;  %v1553_v53 = vadd.f32 %v656_v39, %v1518_v59  ;;  %v675_v2 = vsub.f32 -2.0794415, %v1547_v51 }
  0xdf   : > { %v987_v50 = vpop.eup %986  ;;  %v662_v3 = vmul.f32 0.6931472, %v985_v0  ;;  %v1557_v54 = vadd.f32 %v658_v52, %v1520_v60  ;;  %v676_v10 = vsub.f32 -2.0794415, %v1550_v45 }
  0xe0   : > { %v989_v4 = vpop.eup %988  ;;  %v664_v5 = vmul.f32 0.6931472, %v987_v50  ;;  %v1561_v55 = vadd.f32 %v660_v1, %v1522_v61  ;;  %v677_v58 = vsub.f32 -2.0794415, %v1553_v53  ;;  %v683_v11 = vsub.f32 %v675_v2, %v1362_v21 }
  0xe1   : > { %v666_v9 = vmul.f32 0.6931472, %v989_v4  ;;  %v1565_v59 = vadd.f32 %v662_v3, %v1524_v63  ;;  %v678_v56 = vsub.f32 -2.0794415, %v1557_v54  ;;  %v684_v63 = vsub.f32 %v676_v10, %v1364_v12 }
  0xe2   : > { %v1569_v57 = vadd.f32 %v664_v5, %v1526_v62  ;;  %v679_v60 = vsub.f32 -2.0794415, %v1561_v55  ;;  %v685_v62 = vsub.f32 %v677_v58, %v1366_v22 }
  0xe3   : > { %v1576_v61 = vadd.f32 %v666_v9, %v1528_v41  ;;  %v680_v44 = vsub.f32 -2.0794415, %v1565_v59  ;;  %v686_v41 = vsub.f32 %v678_v56, %v1368_v26 }
  0xe4   : > { %v681_v46 = vsub.f32 -2.0794415, %v1569_v57  ;;  %v687_v14 = vsub.f32 %v679_v60, %v1370_v13 }
  0xe5   : > { %v682_v15 = vsub.f32 -2.0794415, %v1576_v61  ;;  %v688_v34 = vsub.f32 %v680_v44, %v1372_v27 }
  0xe6   : > { %v689_v24 = vsub.f32 %v681_v46, %v1374_v31  ;;  %v691_v35 = vmax.f32 %v683_v11, %v687_v14 }
  0xe7   : > { %v690_v6 = vsub.f32 %v682_v15, %v1376_v33  ;;  %v692_v16 = vmax.f32 %v684_v63, %v688_v34 }
  0xe8   : > { %v693_v18 = vmax.f32 %v685_v62, %v689_v24 }
  0xe9   : > { %v694_v47 = vmax.f32 %v686_v41, %v690_v6  ;;  %v695_v7 = vmax.f32 %v691_v35, %v692_v16 }
  0xeb   : > { %v696_v23 = vmax.f32 %v693_v18, %v694_v47 }
  0xed   : > { %v697_v37 = vmax.f32 %v695_v7, %v696_v23 }
  0xef   : > { %v698_v43 = vsub.f32 %v683_v11, %v697_v37  ;;  %v699_v8 = vsub.f32 %v684_v63, %v697_v37  ;;  %v700_v28 = vsub.f32 %v685_v62, %v697_v37  ;;  %v701_v38 = vsub.f32 %v686_v41, %v697_v37 }
  0xf0   : > { %v702_v29 = vsub.f32 %v687_v14, %v697_v37  ;;  %v703_v20 = vsub.f32 %v688_v34, %v697_v37  ;;  %v704_v32 = vsub.f32 %v689_v24, %v697_v37  ;;  %v705_v36 = vsub.f32 %v690_v6, %v697_v37 }
  0xf1   : > { %v706_v19 = vmul.f32 1.442695, %v698_v43  ;;  %v708_v17 = vmul.f32 1.442695, %v699_v8  ;;  %v710_v25 = vmul.f32 1.442695, %v700_v28 }
  0xf2   : > { %v712_v30 = vmul.f32 1.442695, %v701_v38  ;;  %v714_v48 = vmul.f32 1.442695, %v702_v29  ;;  %v716_v40 = vmul.f32 1.442695, %v703_v20 }
  0xf3   : > { %990 = vpow2.f32 %v706_v19  ;;  %v718_v49 = vmul.f32 1.442695, %v704_v32  ;;  %v720_v52 = vmul.f32 1.442695, %v705_v36 }
  0xf4   : > { %992 = vpow2.f32 %v708_v17 }
  0xf5   : > { %994 = vpow2.f32 %v710_v25 }
  0xf6   : > { %996 = vpow2.f32 %v712_v30 }
  0xf7   : > { %998 = vpow2.f32 %v714_v48 }
  0xf8   : > { %1000 = vpow2.f32 %v716_v40 }
  0xf9   : > { %v991_v39 = vpop.eup %990  ;;  %1002 = vpow2.f32 %v718_v49 }
  0xfa   : > { %v993_v42 = vpop.eup %992  ;;  %1004 = vpow2.f32 %v720_v52 }
  0xfb   : > { %v995_v0 = vpop.eup %994  ;;  %v722_v1 = vadd.f32 %v993_v42, %v991_v39 }
  0xfc   : > { %v997_v50 = vpop.eup %996 }
  0xfd   : > { %v723_v3 = vadd.f32 %v995_v0, %v722_v1  ;;  %v999_v4 = vpop.eup %998 }
  0xfe   : > { %v1001_v9 = vpop.eup %1000 }
  0xff   : > { %v724_v5 = vadd.f32 %v997_v50, %v723_v3  ;;  %v1003_v63 = vpop.eup %1002 }
 0x100   : > { %v1005_v14 = vpop.eup %1004 }
 0x101   : > { %v725_v11 = vadd.f32 %v999_v4, %v724_v5 }
 0x103   : > { %v726_v62 = vadd.f32 %v1001_v9, %v725_v11 }
 0x105   : > { %v727_v41 = vadd.f32 %v1003_v63, %v726_v62 }
 0x107   : > { %v728_v34 = vadd.f32 %v1005_v14, %v727_v41 }
 0x109   : > { %1006 = vlog2.f32 %v728_v34 }
 0x10f   : > { %v1007_v24 = vpop.eup %1006 }
 0x110   : > { %v730_v35 = vmul.f32 0.6931472, %v1007_v24 }
 0x112   : > { %v731_v6 = vadd.f32 %v730_v35, %v697_v37  ;;  %302 = sbr.rel (!%p300_p0) target bundleno = 70 (0x46), region = 35 }
 0x114   : > { %v732_v18 = vsub.f32 -2.0794415, %v731_v6  }
 0x116   : > { %v1661_v16 = vmov %v732_v18  ;;  %v734_v47 = vadd.f32 (%p300_p0), %v732_v18, %v676_v10  ;;  %v735_v7 = vadd.f32 (%p300_p0), %v732_v18, %v677_v58  ;;  %v736_v23 = vadd.f32 (%p300_p0), %v732_v18, %v678_v56 }
 0x117   :  { %v733_v16 = vadd.f32 %v732_v18, %v675_v2  ;;  %v737_v37 = vadd.f32 %v732_v18, %v679_v60  ;;  %v738_v43 = vadd.f32 %v732_v18, %v680_v44  ;;  %v739_v8 = vadd.f32 %v732_v18, %v681_v46 }
 0x118   :  { %v740_v51 = vadd.f32 %v732_v18, %v682_v15  ;;  %v742_v53 = vsub.f32 %v734_v47, %v1364_v12  ;;  %v743_v2 = vsub.f32 %v735_v7, %v1366_v22  ;;  %v744_v54 = vsub.f32 %v736_v23, %v1368_v26 }
 0x119   :  { %v741_v45 = vsub.f32 %v733_v16, %v1362_v21  ;;  %v745_v10 = vsub.f32 %v737_v37, %v1370_v13  ;;  %v746_v55 = vsub.f32 %v738_v43, %v1372_v27  ;;  %v747_v58 = vsub.f32 %v739_v8, %v1374_v31 }
 0x11a   :  { %v751_v56 = vmul.f32 1.442695, %v742_v53  ;;  %v753_v57 = vmul.f32 1.442695, %v743_v2  ;;  %v748_v60 = vsub.f32 %v740_v51, %v1376_v33  ;;  %v755_v61 = vmul.f32 1.442695, %v744_v54 }
 0x11b   :  { %v749_v59 = vmul.f32 1.442695, %v741_v45  ;;  %v757_v44 = vmul.f32 1.442695, %v745_v10  ;;  %v759_v46 = vmul.f32 1.442695, %v746_v55 }
 0x11c   :  { %v761_v15 = vmul.f32 1.442695, %v747_v58  ;;  %v763_v28 = vmul.f32 1.442695, %v748_v60 }
 0x11d   :  { %1008 = vpow2.f32 %v749_v59 }
 0x11e   :  { %1010 = vpow2.f32 %v751_v56 }
 0x11f   :  { %1012 = vpow2.f32 %v753_v57 }
 0x120   :  { %1014 = vpow2.f32 %v755_v61 }
 0x121   :  { %1016 = vpow2.f32 %v757_v44 }
 0x122   :  { %1018 = vpow2.f32 %v759_v46 }
 0x123   :  { %v1009_v38 = vpop.eup %1008  ;;  %1020 = vpow2.f32 %v761_v15 }
 0x124   :  { %v1011_v29 = vpop.eup %1010  ;;  %1022 = vpow2.f32 %v763_v28  ;;  %v765_v19 = vmul.f32 %v1009_v38, %v1362_v21 }
 0x125   :  { %v1013_v17 = vpop.eup %1012  ;;  %v766_v25 = vmul.f32 %v1011_v29, %v1364_v12 }
 0x126   :  { %v1015_v20 = vpop.eup %1014  ;;  %v767_v30 = vmul.f32 %v1013_v17, %v1366_v22  ;;  %v773_v32 = vrot.slane %v765_v19, 4 }
 0x127   :  { %v1017_v48 = vpop.eup %1016  ;;  %v768_v36 = vmul.f32 %v1015_v20, %v1368_v26  ;;  %v779_v40 = vrot.slane %v766_v25, 4 }
 0x128   :  { %v1019_v49 = vpop.eup %1018  ;;  %v769_v39 = vmul.f32 %v1017_v48, %v1370_v13  ;;  %v774_v42 = vadd.f32 %v773_v32, %v765_v19  ;;  %v785_v52 = vrot.slane %v767_v30, 4 }
 0x129   :  { %v1021_v0 = vpop.eup %1020  ;;  %v770_v1 = vmul.f32 %v1019_v49, %v1372_v27  ;;  %v780_v21 = vadd.f32 %v779_v40, %v766_v25  ;;  %v791_v50 = vrot.slane %v768_v36, 4 }
 0x12a   :  { %v1023_v3 = vpop.eup %1022  ;;  %v771_v12 = vmul.f32 %v1021_v0, %v1374_v31  ;;  %v775_v4 = vrot.slane %v774_v42, 2  ;;  %v786_v22 = vadd.f32 %v785_v52, %v767_v30  ;;  %v797_v5 = vrot.slane %v769_v39, 4 }
 0x12b   :  { %v772_v9 = vmul.f32 %v1023_v3, %v1376_v33  ;;  %v781_v26 = vrot.slane %v780_v21, 2  ;;  %v792_v11 = vadd.f32 %v791_v50, %v768_v36  ;;  %v803_v63 = vrot.slane %v770_v1, 4 }
 0x12c   :  { %v776_v62 = vadd.f32 %v775_v4, %v774_v42  ;;  %v787_v13 = vrot.slane %v786_v22, 2  ;;  %v798_v14 = vadd.f32 %v797_v5, %v769_v39  ;;  %v809_v41 = vrot.slane %v771_v12, 4 }
 0x12d   :  { %v782_v34 = vadd.f32 %v781_v26, %v780_v21  ;;  %v793_v24 = vrot.slane %v792_v11, 2  ;;  %v804_v27 = vadd.f32 %v803_v63, %v770_v1  ;;  %v815_v35 = vrot.slane %v772_v9, 4 }
 0x12e   :  { %v777_v6 = vrot.slane %v776_v62, 1  ;;  %v788_v18 = vadd.f32 %v787_v13, %v786_v22  ;;  %v799_v16 = vrot.slane %v798_v14, 2  ;;  %v810_v31 = vadd.f32 %v809_v41, %v771_v12 }
 0x12f   :  { %v783_v47 = vrot.slane %v782_v34, 1  ;;  %v794_v7 = vadd.f32 %v793_v24, %v792_v11  ;;  %v805_v23 = vrot.slane %v804_v27, 2  ;;  %v816_v37 = vadd.f32 %v815_v35, %v772_v9 }
 0x130   :  { %v778_v33 = vadd.f32 %v777_v6, %v776_v62  ;;  %v789_v43 = vrot.slane %v788_v18, 1  ;;  %v800_v8 = vadd.f32 %v799_v16, %v798_v14  ;;  %v811_v51 = vrot.slane %v810_v31, 2 }
 0x131   :  { %v784_v45 = vadd.f32 %v783_v47, %v782_v34  ;;  %v795_v53 = vrot.slane %v794_v7, 1  ;;  %v806_v2 = vadd.f32 %v805_v23, %v804_v27  ;;  %v817_v54 = vrot.slane %v816_v37, 2 }
 0x132   :  { %v790_v10 = vadd.f32 %v789_v43, %v788_v18  ;;  %v801_v55 = vrot.slane %v800_v8, 1  ;;  %v812_v58 = vadd.f32 %v811_v51, %v810_v31 }
 0x133   :  { %v796_v59 = vadd.f32 %v795_v53, %v794_v7  ;;  %v807_v56 = vrot.slane %v806_v2, 1  ;;  %v818_v57 = vadd.f32 %v817_v54, %v816_v37  ;;  %v821_v60 = vadd.f32 %v784_v45, %v778_v33 }
 0x134   :  { %v802_v61 = vadd.f32 %v801_v55, %v800_v8  ;;  %v813_v44 = vrot.slane %v812_v58, 1 }
 0x135   :  { %v822_v46 = vadd.f32 %v821_v60, %v790_v10  ;;  %v808_v15 = vadd.f32 %v807_v56, %v806_v2  ;;  %v819_v28 = vrot.slane %v818_v57, 1 }
 0x136   :  { %v814_v29 = vadd.f32 %v813_v44, %v812_v58 }
 0x137   :  { %v823_v38 = vadd.f32 %v822_v46, %v796_v59  ;;  %v820_v17 = vadd.f32 %v819_v28, %v818_v57 }
 0x139   :  { %v824_v19 = vadd.f32 %v823_v38, %v802_v61 }
 0x13b   :  { %v825_v25 = vadd.f32 %v824_v19, %v808_v15 }
 0x13d   :  { %v826_v20 = vadd.f32 %v825_v25, %v814_v29 }
 0x13f   :  { %v827_v30 = vadd.f32 %v826_v20, %v820_v17 }
 0x141   :  { %v828_v32 = vmul.f32 0.01, %v827_v30 }
 0x143   :  { %829 = vst [vmem:[%s1643_s2] sm:$0xff] %v828_v32 }

</bundles_post_ra>
